<compile_context>
chip_gen: v6e
topology: v6e:2x2x1
jax: 0.10.0
libtpu: 0.0.40
codegen_flags: <defaults>
</compile_context>

<pallas_src>
import jax
import jax.numpy as jnp
from jax.experimental import pallas as pl
from jax.experimental.pallas import tpu as pltpu

# Original model dims.
IN_F, HID, OUT_F = 784, 64, 10
# Lane-dense padded dims used inside the kernel (K is NOT padded).
HID_P, OUT_P = 128, 128
NEG_INF = -1e9                       # bias on pad logit lanes -> exp() == 0
ALIGN = 16                           # bf16 output min sublane tile


def mlp_kernel(x_ref, w1_ref, b1_ref, w2_ref, b2_ref, w3_ref, b3_ref,
               w4_ref, b4_ref, o_ref):
    # x arrives f32 straight from HBM (no wrapper pre-pass); cast to bf16 here so
    # fc1 runs as a bf16 MXU matmul with f32 accumulation. The cast is VPU work
    # fully hidden under the x DMA.
    x = x_ref[...].astype(jnp.bfloat16)
    # fc1 + relu
    h = jnp.dot(x, w1_ref[...], preferred_element_type=jnp.float32) + b1_ref[...]
    h = jnp.maximum(h, 0.0).astype(jnp.bfloat16)
    # fc2 + relu
    h = jnp.dot(h, w2_ref[...], preferred_element_type=jnp.float32) + b2_ref[...]
    h = jnp.maximum(h, 0.0).astype(jnp.bfloat16)
    # fc3 + relu
    h = jnp.dot(h, w3_ref[...], preferred_element_type=jnp.float32) + b3_ref[...]
    h = jnp.maximum(h, 0.0).astype(jnp.bfloat16)
    # fc4 -> 128-wide logits (pad lanes carry a -1e9 bias)
    logits = jnp.dot(h, w4_ref[...],
                     preferred_element_type=jnp.float32) + b4_ref[...]
    # log_softmax along the (lane) feature axis; pad lanes contribute exp()==0.
    m = jnp.max(logits, axis=1, keepdims=True)
    shifted = logits - m
    lse = jnp.log(jnp.sum(jnp.exp(shifted), axis=1, keepdims=True))
    o_ref[...] = (shifted - lse).astype(o_ref.dtype)   # bf16 lane-dense writeback


def init_linear(key, fan_in, fan_out):
    # PyTorch nn.Linear default init: U(-1/sqrt(fan_in), 1/sqrt(fan_in)).
    # Stored as [in, out] so the kernel computes x @ W + b.
    kw, kb = jax.random.split(key)
    bound = 1.0 / jnp.sqrt(fan_in)
    w = jax.random.uniform(kw, (fan_in, fan_out), jnp.float32, -bound, bound)
    b = jax.random.uniform(kb, (1, fan_out), jnp.float32, -bound, bound)
    return w, b


def prepare_params(params):
    """One-time wrapper-side lane padding + bf16 cast of the weights."""
    (w1, b1, w2, b2, w3, b3, w4, b4) = params

    def pad2(a, rows, cols):
        return jnp.pad(a, ((0, rows - a.shape[0]), (0, cols - a.shape[1])))

    w1p = pad2(w1, IN_F, HID_P).astype(jnp.bfloat16)     # (784, 128) — no K pad
    w2p = pad2(w2, HID, HID_P)[:HID_P]                   # rows 64 -> pad to 128
    w2p = pad2(w2, HID_P, HID_P).astype(jnp.bfloat16)
    w3p = pad2(w3, HID_P, HID_P).astype(jnp.bfloat16)
    w4p = pad2(w4, HID_P, OUT_P).astype(jnp.bfloat16)
    b1p = pad2(b1, 1, HID_P).astype(jnp.float32)         # zero pads; ReLU keeps them 0
    b2p = pad2(b2, 1, HID_P).astype(jnp.float32)
    b3p = pad2(b3, 1, HID_P).astype(jnp.float32)
    # pad logit lanes get a hugely negative bias so log_softmax ignores them
    b4p = jnp.pad(b4.astype(jnp.float32),
                  ((0, 0), (0, OUT_P - b4.shape[1])),
                  constant_values=NEG_INF)
    return (w1p, b1p, w2p, b2p, w3p, b3p, w4p, b4p)


def net_forward(x, prepared, *, tb=2048):
    """x: [B, 784] f32; prepared: output of prepare_params. Returns [B, 10] f32."""
    B = x.shape[0]
    B_al = ((B + ALIGN - 1) // ALIGN) * ALIGN

    # Tile policy:
    #  * cap at 2048 rows: double-buffered f32 x tiles (2 * tb*784*4 B) stay well
    #    inside the 32 MiB default scoped VMEM limit on v7x (v5e/v6e have more),
    #  * cap at half the aligned batch so grid >= 2 and both v7x TCs get work,
    #  * multiple of 16 so the bf16 output block meets the (16, 128) min tile.
    tb = min(tb, 2048)
    if B_al >= 2 * ALIGN:
        tb = min(tb, (B_al // 2) // ALIGN * ALIGN)
    tb = max(ALIGN, (min(tb, B_al) // ALIGN) * ALIGN)
    assert tb % ALIGN == 0
    Bp = ((B + tb - 1) // tb) * tb

    # Only pad the batch when needed (zero-copy for B % tb == 0); x stays f32,
    # the bf16 cast happens inside the kernel.
    xp = x if Bp == B else jnp.pad(x, ((0, Bp - B), (0, 0)))
    (w1, b1, w2, b2, w3, b3, w4, b4) = prepared

    def batch_spec(shape):
        return pl.BlockSpec(shape, lambda i: (i, 0))

    def const_spec(shape):
        return pl.BlockSpec(shape, lambda i: (0, 0))   # VMEM-resident across grid

    flops = 2 * Bp * (IN_F * HID_P + 2 * HID_P * HID_P + HID_P * OUT_P)
    transcendentals = Bp * (OUT_P + 1)                 # exp + log per row
    bytes_accessed = (xp.size * 4
                      + (w1.size + w2.size + w3.size + w4.size) * 2
                      + (b1.size + b2.size + b3.size + b4.size) * 4
                      + Bp * OUT_P * 2)

    out = pl.pallas_call(
        mlp_kernel,
        out_shape=jax.ShapeDtypeStruct((Bp, OUT_P), jnp.bfloat16),
        grid=(Bp // tb,),
        in_specs=[
            batch_spec((tb, IN_F)),                    # (tb, 784): full-extent last dim
            const_spec((IN_F, HID_P)), const_spec((1, HID_P)),
            const_spec((HID_P, HID_P)), const_spec((1, HID_P)),
            const_spec((HID_P, HID_P)), const_spec((1, HID_P)),
            const_spec((HID_P, OUT_P)), const_spec((1, OUT_P)),
        ],
        out_specs=batch_spec((tb, OUT_P)),
        compiler_params=pltpu.CompilerParams(
            dimension_semantics=("parallel",),         # megacore split on v7x
        ),
        cost_estimate=pl.CostEstimate(
            flops=flops,
            transcendentals=transcendentals,
            bytes_accessed=bytes_accessed,
        ),
    )(xp, w1, b1, w2, b2, w3, b3, w4, b4)

    # Slice off batch/logit padding; return f32 like the PyTorch module.
    return out[:B, :OUT_F].astype(jnp.float32)


if __name__ == "__main__":
    key = jax.random.PRNGKey(0)
    k_x, k1, k2, k3, k4 = jax.random.split(key, 5)

    B = 32
    x = jax.random.normal(k_x, (B, IN_F), jnp.float32)

    w1, b1 = init_linear(k1, IN_F, HID)
    w2, b2 = init_linear(k2, HID, HID)
    w3, b3 = init_linear(k3, HID, HID)
    w4, b4 = init_linear(k4, HID, OUT_F)
    params = (w1, b1, w2, b2, w3, b3, w4, b4)
    prepared = prepare_params(params)

    # With B=32 the tile clamps to tb=16 -> grid=(2,), so the batch pipeline
    # (and the v7x two-TC split) is actually exercised.
    out = net_forward(x, prepared)
    out = jax.block_until_ready(out)

    # Reference in plain f32 JAX (PyTorch semantics).
    h = jnp.maximum(x @ w1 + b1, 0.0)
    h = jnp.maximum(h @ w2 + b2, 0.0)
    h = jnp.maximum(h @ w3 + b3, 0.0)
    logits = h @ w4 + b4
    ref = jax.nn.log_softmax(logits, axis=1)

    assert out.shape == (B, OUT_F)
    max_err = float(jnp.max(jnp.abs(out - ref)))
    # bf16 matmul operands + bf16 logit storage -> loose tolerance vs f32 reference.
    assert jnp.allclose(out, ref, atol=5e-2, rtol=0.0), max_err

    print("KERNEL_OK")
</pallas_src>

<mosaic_0001>
module attributes {stable_mosaic.version = 11 : i64} {
  func.func @mlp_kernel(%arg0: i32, %arg1: memref<16x784xf32, #tpu.memory_space<vmem>>, %arg2: memref<784x128xbf16, #tpu.memory_space<vmem>>, %arg3: memref<1x128xf32, #tpu.memory_space<vmem>>, %arg4: memref<128x128xbf16, #tpu.memory_space<vmem>>, %arg5: memref<1x128xf32, #tpu.memory_space<vmem>>, %arg6: memref<128x128xbf16, #tpu.memory_space<vmem>>, %arg7: memref<1x128xf32, #tpu.memory_space<vmem>>, %arg8: memref<128x128xbf16, #tpu.memory_space<vmem>>, %arg9: memref<1x128xf32, #tpu.memory_space<vmem>>, %arg10: memref<16x128xbf16, #tpu.memory_space<vmem>>) attributes {dimension_semantics = [#tpu.dimension_semantics<parallel>], iteration_bounds = array<i64: 2>, scalar_prefetch = 0 : i64, scratch_operands = 0 : i64, tpu.core_type = #tpu.core_type<tc>, window_params = [{transform_indices = @transform_0, window_bounds = array<i64: 16, 784>}, {pipeline_mode = #tpu.pipeline_mode<synchronous>, transform_indices = @transform_1, window_bounds = array<i64: 784, 128>}, {pipeline_mode = #tpu.pipeline_mode<synchronous>, transform_indices = @transform_2, window_bounds = array<i64: 1, 128>}, {pipeline_mode = #tpu.pipeline_mode<synchronous>, transform_indices = @transform_3, window_bounds = array<i64: 128, 128>}, {pipeline_mode = #tpu.pipeline_mode<synchronous>, transform_indices = @transform_4, window_bounds = array<i64: 1, 128>}, {pipeline_mode = #tpu.pipeline_mode<synchronous>, transform_indices = @transform_5, window_bounds = array<i64: 128, 128>}, {pipeline_mode = #tpu.pipeline_mode<synchronous>, transform_indices = @transform_6, window_bounds = array<i64: 1, 128>}, {pipeline_mode = #tpu.pipeline_mode<synchronous>, transform_indices = @transform_7, window_bounds = array<i64: 128, 128>}, {pipeline_mode = #tpu.pipeline_mode<synchronous>, transform_indices = @transform_8, window_bounds = array<i64: 1, 128>}, {transform_indices = @transform_9, window_bounds = array<i64: 16, 128>}]} {
    %c0 = arith.constant 0 : index
    %c0_0 = arith.constant 0 : index
    %0 = vector.load %arg1[%c0, %c0_0] : memref<16x784xf32, #tpu.memory_space<vmem>>, vector<16x784xf32>
    %1 = arith.truncf %0 : vector<16x784xf32> to vector<16x784xbf16>
    %c0_1 = arith.constant 0 : index
    %c0_2 = arith.constant 0 : index
    %2 = vector.load %arg2[%c0_1, %c0_2] : memref<784x128xbf16, #tpu.memory_space<vmem>>, vector<784x128xbf16>
    %cst = arith.constant dense<0.000000e+00> : vector<16x128xf32>
    %3 = tpu.matmul %1, %2, %cst {dimension_numbers = #tpu.dot_dimension_numbers<[1], [0], [0], [1], [0, 0, 1, 1], [], []>} : vector<16x784xbf16>, vector<784x128xbf16>, vector<16x128xf32> -> vector<16x128xf32>
    %c0_3 = arith.constant 0 : index
    %c0_4 = arith.constant 0 : index
    %4 = vector.load %arg3[%c0_3, %c0_4] : memref<1x128xf32, #tpu.memory_space<vmem>>, vector<1x128xf32>
    %5 = vector.broadcast %4 : vector<1x128xf32> to vector<16x128xf32>
    %6 = arith.addf %3, %5 : vector<16x128xf32>
    %cst_5 = arith.constant 0.000000e+00 : f32
    %7 = vector.broadcast %cst_5 : f32 to vector<16x128xf32>
    %8 = arith.maximumf %6, %7 : vector<16x128xf32>
    %9 = arith.truncf %8 : vector<16x128xf32> to vector<16x128xbf16>
    %c0_6 = arith.constant 0 : index
    %c0_7 = arith.constant 0 : index
    %10 = vector.load %arg4[%c0_6, %c0_7] : memref<128x128xbf16, #tpu.memory_space<vmem>>, vector<128x128xbf16>
    %cst_8 = arith.constant dense<0.000000e+00> : vector<16x128xf32>
    %11 = tpu.matmul %9, %10, %cst_8 {dimension_numbers = #tpu.dot_dimension_numbers<[1], [0], [0], [1], [0, 0, 1, 1], [], []>} : vector<16x128xbf16>, vector<128x128xbf16>, vector<16x128xf32> -> vector<16x128xf32>
    %c0_9 = arith.constant 0 : index
    %c0_10 = arith.constant 0 : index
    %12 = vector.load %arg5[%c0_9, %c0_10] : memref<1x128xf32, #tpu.memory_space<vmem>>, vector<1x128xf32>
    %13 = vector.broadcast %12 : vector<1x128xf32> to vector<16x128xf32>
    %14 = arith.addf %11, %13 : vector<16x128xf32>
    %cst_11 = arith.constant 0.000000e+00 : f32
    %15 = vector.broadcast %cst_11 : f32 to vector<16x128xf32>
    %16 = arith.maximumf %14, %15 : vector<16x128xf32>
    %17 = arith.truncf %16 : vector<16x128xf32> to vector<16x128xbf16>
    %c0_12 = arith.constant 0 : index
    %c0_13 = arith.constant 0 : index
    %18 = vector.load %arg6[%c0_12, %c0_13] : memref<128x128xbf16, #tpu.memory_space<vmem>>, vector<128x128xbf16>
    %cst_14 = arith.constant dense<0.000000e+00> : vector<16x128xf32>
    %19 = tpu.matmul %17, %18, %cst_14 {dimension_numbers = #tpu.dot_dimension_numbers<[1], [0], [0], [1], [0, 0, 1, 1], [], []>} : vector<16x128xbf16>, vector<128x128xbf16>, vector<16x128xf32> -> vector<16x128xf32>
    %c0_15 = arith.constant 0 : index
    %c0_16 = arith.constant 0 : index
    %20 = vector.load %arg7[%c0_15, %c0_16] : memref<1x128xf32, #tpu.memory_space<vmem>>, vector<1x128xf32>
    %21 = vector.broadcast %20 : vector<1x128xf32> to vector<16x128xf32>
    %22 = arith.addf %19, %21 : vector<16x128xf32>
    %cst_17 = arith.constant 0.000000e+00 : f32
    %23 = vector.broadcast %cst_17 : f32 to vector<16x128xf32>
    %24 = arith.maximumf %22, %23 : vector<16x128xf32>
    %25 = arith.truncf %24 : vector<16x128xf32> to vector<16x128xbf16>
    %c0_18 = arith.constant 0 : index
    %c0_19 = arith.constant 0 : index
    %26 = vector.load %arg8[%c0_18, %c0_19] : memref<128x128xbf16, #tpu.memory_space<vmem>>, vector<128x128xbf16>
    %cst_20 = arith.constant dense<0.000000e+00> : vector<16x128xf32>
    %27 = tpu.matmul %25, %26, %cst_20 {dimension_numbers = #tpu.dot_dimension_numbers<[1], [0], [0], [1], [0, 0, 1, 1], [], []>} : vector<16x128xbf16>, vector<128x128xbf16>, vector<16x128xf32> -> vector<16x128xf32>
    %c0_21 = arith.constant 0 : index
    %c0_22 = arith.constant 0 : index
    %28 = vector.load %arg9[%c0_21, %c0_22] : memref<1x128xf32, #tpu.memory_space<vmem>>, vector<1x128xf32>
    %29 = vector.broadcast %28 : vector<1x128xf32> to vector<16x128xf32>
    %30 = arith.addf %27, %29 : vector<16x128xf32>
    %cst_23 = arith.constant dense<0xFF800000> : vector<16xf32>
    %31 = vector.multi_reduction <maximumf>, %30, %cst_23 [1] : vector<16x128xf32> to vector<16xf32>
    %32 = vector.shape_cast %31 : vector<16xf32> to vector<16x1xf32>
    %33 = vector.broadcast %32 : vector<16x1xf32> to vector<16x128xf32>
    %34 = arith.subf %30, %33 : vector<16x128xf32>
    %35 = math.exp %34 : vector<16x128xf32>
    %cst_24 = arith.constant dense<0.000000e+00> : vector<16xf32>
    %36 = vector.multi_reduction <add>, %35, %cst_24 [1] : vector<16x128xf32> to vector<16xf32>
    %37 = vector.shape_cast %36 : vector<16xf32> to vector<16x1xf32>
    %38 = math.log %37 : vector<16x1xf32>
    %39 = vector.broadcast %38 : vector<16x1xf32> to vector<16x128xf32>
    %40 = arith.subf %34, %39 : vector<16x128xf32>
    %41 = arith.truncf %40 : vector<16x128xf32> to vector<16x128xbf16>
    %c0_25 = arith.constant 0 : index
    %c0_26 = arith.constant 0 : index
    %42 = vector.load %arg10[%c0_25, %c0_26] : memref<16x128xbf16, #tpu.memory_space<vmem>>, vector<16x128xbf16>
    tpu.vector_store %arg10[%c0_25, %c0_26], %41 {strides = array<i32>} : memref<16x128xbf16, #tpu.memory_space<vmem>>, vector<16x128xbf16>,
    return
  }
  func.func @transform_0(%arg0: i32) -> (i32, i32) {
    %c0_i32 = arith.constant 0 : i32
    %c0_i32_0 = arith.constant 0 : i32
    return %arg0, %c0_i32 : i32, i32
  }
  func.func @transform_1(%arg0: i32) -> (i32, i32) {
    %c0_i32 = arith.constant 0 : i32
    %c0_i32_0 = arith.constant 0 : i32
    %c0_i32_1 = arith.constant 0 : i32
    return %c0_i32, %c0_i32_0 : i32, i32
  }
  func.func @transform_2(%arg0: i32) -> (i32, i32) {
    %c0_i32 = arith.constant 0 : i32
    %c0_i32_0 = arith.constant 0 : i32
    %c0_i32_1 = arith.constant 0 : i32
    return %c0_i32, %c0_i32_0 : i32, i32
  }
  func.func @transform_3(%arg0: i32) -> (i32, i32) {
    %c0_i32 = arith.constant 0 : i32
    %c0_i32_0 = arith.constant 0 : i32
    %c0_i32_1 = arith.constant 0 : i32
    return %c0_i32, %c0_i32_0 : i32, i32
  }
  func.func @transform_4(%arg0: i32) -> (i32, i32) {
    %c0_i32 = arith.constant 0 : i32
    %c0_i32_0 = arith.constant 0 : i32
    %c0_i32_1 = arith.constant 0 : i32
    return %c0_i32, %c0_i32_0 : i32, i32
  }
  func.func @transform_5(%arg0: i32) -> (i32, i32) {
    %c0_i32 = arith.constant 0 : i32
    %c0_i32_0 = arith.constant 0 : i32
    %c0_i32_1 = arith.constant 0 : i32
    return %c0_i32, %c0_i32_0 : i32, i32
  }
  func.func @transform_6(%arg0: i32) -> (i32, i32) {
    %c0_i32 = arith.constant 0 : i32
    %c0_i32_0 = arith.constant 0 : i32
    %c0_i32_1 = arith.constant 0 : i32
    return %c0_i32, %c0_i32_0 : i32, i32
  }
  func.func @transform_7(%arg0: i32) -> (i32, i32) {
    %c0_i32 = arith.constant 0 : i32
    %c0_i32_0 = arith.constant 0 : i32
    %c0_i32_1 = arith.constant 0 : i32
    return %c0_i32, %c0_i32_0 : i32, i32
  }
  func.func @transform_8(%arg0: i32) -> (i32, i32) {
    %c0_i32 = arith.constant 0 : i32
    %c0_i32_0 = arith.constant 0 : i32
    %c0_i32_1 = arith.constant 0 : i32
    return %c0_i32, %c0_i32_0 : i32, i32
  }
  func.func @transform_9(%arg0: i32) -> (i32, i32) {
    %c0_i32 = arith.constant 0 : i32
    %c0_i32_0 = arith.constant 0 : i32
    return %arg0, %c0_i32 : i32, i32
  }
}

</mosaic_0001>

<bundles_post_ra>
// kernel: tpu_custom_call.1
= control target key start
LH: loop header
LB: loop body
LE: loop exit
PB: predicated region body
PF: predicated region fallthrough
CT: control target
= control target key end

     0   :  { %s2502_s0 = inlined_call_operand.hbm [shape: f32[32,784], index: 0, kind: input, shape index: {}]   ;;  %s2503_s1 = inlined_call_operand.hbm [shape: bf16[784,128], index: 1, kind: input, shape index: {}]   ;;  %s2504_s2 = inlined_call_operand.vmem [shape: f32[1,128], index: 2, kind: input, shape index: {}]   ;;  %s2505_s3 = inlined_call_operand.hbm [shape: bf16[128,128], index: 3, kind: input, shape index: {}]   ;;  %s2506_s4 = inlined_call_operand.vmem [shape: f32[1,128], index: 4, kind: input, shape index: {}]   ;;  %s2507_s5 = inlined_call_operand.hbm [shape: bf16[128,128], index: 5, kind: input, shape index: {}]   ;;  %s2508_s6 = inlined_call_operand.vmem [shape: f32[1,128], index: 6, kind: input, shape index: {}]   ;;  %s2509_s7 = inlined_call_operand.hbm [shape: bf16[128,128], index: 7, kind: input, shape index: {}]   ;;  %s2510_s8 = inlined_call_operand.vmem [shape: f32[1,128], index: 8, kind: input, shape index: {}]   ;;  %s2511_s9 = inlined_call_operand.hbm [shape: bf16[32,128], index: 9, kind: output, shape index: {}]  }
   0x1   :  { %2516 = sst [smem:[#allocation16_spill]] %s2503_s1 }
   0x2   :  { %2517 = sst [smem:[#allocation17_spill]] %s2505_s3 }
   0x3   :  { %2518 = sst [smem:[#allocation18_spill]] %s2507_s5 }
   0x4   :  { %14 = vsyncpa [#allocation3], 0 }
   0x5   :  { %16 = vsyncpa [#allocation3 + $0x1], 0 }
   0x6   :  { %17 = vsyncpa [#allocation6], 0 }
   0x7   :  { %18 = vsyncpa [#allocation9], 0 }
   0x8   :  { %19 = vsyncpa [#allocation4], 0 }
   0x9   :  { %21 = vsyncpa [#allocation4 + $0x1], 0  ;;  %s2220_s30 = smov 0   ;;  %s2222_s10 = smov 0  }
   0xa   :  { %s2224_s11 = smov 0   ;;  %s2226_s12 = smov 0  }
   0xb LB: > { %s2241_s13 = sadd.s32 4294967295, %s2154_s12   ;;  %s1501_s14 = sadd.s32 4294967294, %s2154_s12   ;;  %s2154_s12 = sphi %s2226_s12, %s2540_s12   ;;  %s2150_s11 = sphi %s2224_s11, %s2539_s11   ;;  %s2146_s10 = sphi %s2222_s10, %s2538_s10   ;;  %s2142_s30 = sphi %s2220_s30, %s2537_s30  }
   0xc   : > { %p47_p0 = scmp.ne.s32.totalorder %s2146_s10, %s2142_s30  ;;  %p2512_p1 = scmp.eq.s32.totalorder %s2241_s13, 0 }
   0xd   : > { %p239_p2 = scmp.eq.s32.totalorder %s2241_s13, 1  ;;  %p245_p3 = scmp.eq.s32.totalorder %s1501_s14, 1 }
   0xe   : > { %p2250_p4 = por %p2512_p1, %p47_p0  ;;  %p1502_p5 = scmp.ge.s32.totalorder %s2154_s12, 1 }
   0xf   : > { %p2255_p6 = por %p245_p3, %p47_p0  ;;  %p252_p7 = scmp.lt.s32.totalorder %s2154_s12, 3 }
  0x10   : > { %s2519_s15 = scalar_select %p2250_p4, 1, 0 }
  0x11   : > { %s2520_s16 = scalar_select %p2255_p6, 1, 0 }
  0x12   : > { %p2260_p8 = pnand %p1502_p5, %p252_p7  ;;  %s2156_s18 = smov [#allocation5]  }
  0x13   : > { %s264_s19 = sshll.u32 %s2156_s18, 4  ;;  %s2157_s21 = smov [#allocation8]   ;;  %s265_s19 = int_to_ptr.vmem [resolvable:$true] %s264_s19 }
  0x14   : > { %s2521_s17 = scalar_select %p2260_p8, 1, 0 }
  0x15   : > { %p1794_p9 = pneg %p2260_p8  ;;  %s296_s22 = sshll.u32 %s2157_s21, 4  ;;  %s297_s22 = int_to_ptr.vmem [resolvable:$true] %s296_s22 }
  0x16   : > { %s2158_s23 = smov [#allocation7]   ;;  %s1961_s25 = scalar_lea.vmem %s265_s19, 6272 }
  0x17   : > { %p2269_p11 = pnand %p1794_p9, %p2512_p1  ;;  %s280_s24 = sshll.u32 %s2158_s23, 4  ;;  %s281_s24 = int_to_ptr.vmem [resolvable:$true] %s280_s24 }
  0x18   : > { %p1962_p13 = scmp.ne.s32.totalorder %s265_s19, %s1961_s25  ;;  %p1969_p5 = scmp.lt.s32.totalorder %s265_s19, %s265_s19 }
  0x19   : > { %p1952_p12 = pneg %p2269_p11  ;;  %p1970_p7 = scmp.lt.s32.totalorder %s1961_s25, %s1961_s25 }
  0x1b   : > { %p1964_p0 = pnand %p1962_p13, %p1952_p12  ;;  %p1971_p9 = por %p1970_p7, %p1969_p5 }
  0x1d   : > { %p1965_p3 = pneg %p1964_p0 }
  0x1f   : > { %p1972_p10 = pnand %p1971_p9, %p1965_p3 }
  0x21   : > { %1975 = shalt.err (!%p1972_p10)
}
  0x22   : > { %s2159_s26 = smov 64   ;;  %s2160_s27 = smov 4  }
  0x23   : > { %s2523_s1 = sld [smem:[#allocation16_spill]]  ;;  %s1987_s14 = scalar_lea.vmem %s297_s22, 1024 }
  0x24   : > { %p1988_p13 = scmp.ne.s32.totalorder %s297_s22, %s1987_s14  ;;  %p1995_p3 = scmp.lt.s32.totalorder %s297_s22, %s297_s22 }
  0x25   : > { %p1996_p10 = scmp.lt.s32.totalorder %s1987_s14, %s1987_s14 }
  0x26   : > { %p1990_p0 = pnand %p1988_p13, %p1952_p12 }
  0x27   : > { %p1997_p7 = por %p1996_p10, %p1995_p3 }
  0x28   : > { %p1991_p5 = pneg %p1990_p0 }
  0x29   : > { %1797 = dma.hbm_to_vmem [thread:$0]  (!%p2269_p11), %s2523_s1, 6272, %s265_s19, [#allocation6], %s2159_s26, %s2159_s26, %s2160_s27  }
  0x2a   : > { %p1998_p9 = pnand %p1997_p7, %p1991_p5 }
  0x2c   : > { %2001 = shalt.err (!%p1998_p9)
}
  0x2d   : > { %s2524_s5 = sld [smem:[#allocation18_spill]]  ;;  %s2013_s19 = scalar_lea.vmem %s281_s24, 1024 }
  0x2e   : > { %p2014_p1 = scmp.ne.s32.totalorder %s281_s24, %s2013_s19  ;;  %p2021_p3 = scmp.lt.s32.totalorder %s281_s24, %s281_s24 }
  0x2f   : > { %p2022_p5 = scmp.lt.s32.totalorder %s2013_s19, %s2013_s19 }
  0x30   : > { %p2016_p13 = pnand %p2014_p1, %p1952_p12 }
  0x31   : > { %p2023_p10 = por %p2022_p5, %p2021_p3 }
  0x32   : > { %p2017_p0 = pneg %p2016_p13 }
  0x33   : > { %1803 = dma.hbm_to_vmem [thread:$0]  (!%p2269_p11), %s2524_s5, 1024, %s297_s22, [#allocation9], %s2159_s26, %s2159_s26, %s2160_s27  }
  0x34   : > { %p2024_p7 = pnand %p2023_p10, %p2017_p0 }
  0x36   : > { %2027 = shalt.err (!%p2024_p7)
}
  0x37   : > { %s2525_s3 = sld [smem:[#allocation17_spill]]  ;;  %s2161_s22 = smov [#allocation10]  }
  0x38   : > { %s312_s28 = sshll.u32 %s2161_s22, 4  ;;  %s313_s28 = int_to_ptr.vmem [resolvable:$true] %s312_s28 }
  0x39   : > { %s2039_s29 = scalar_lea.vmem %s313_s28, 1024  ;;  %p2047_p0 = scmp.lt.s32.totalorder %s313_s28, %s313_s28 }
  0x3a   : > { %p2040_p1 = scmp.ne.s32.totalorder %s313_s28, %s2039_s29  ;;  %p2048_p3 = scmp.lt.s32.totalorder %s2039_s29, %s2039_s29 }
  0x3c   : > { %p2042_p9 = pnand %p2040_p1, %p1952_p12  ;;  %p2049_p5 = por %p2048_p3, %p2047_p0 }
  0x3d   : > { %1800 = dma.hbm_to_vmem [thread:$0]  (!%p2269_p11), %s2525_s3, 1024, %s281_s24, [#allocation6], %s2159_s26, %s2159_s26, %s2160_s27  }
  0x3e   : > { %p2043_p13 = pneg %p2042_p9 }
  0x40   : > { %p2050_p10 = pnand %p2049_p5, %p2043_p13 }
  0x42   : > { %2053 = shalt.err (!%p2050_p10)
}
  0x43   : > { %1806 = dma.hbm_to_vmem [thread:$0]  (!%p2269_p11), %s2509_s7, 1024, %s313_s28, [#allocation9], %s2159_s26, %s2159_s26, %s2160_s27  }
  0x44   : > { %s2320_s18 = sadd.s32 1, %s2154_s12   ;;  %s34_s20 = sadd.s32 1, %s2150_s11 }
  0x45   : > { %s31_s21 = ssub.s32 %s2154_s12, %s2320_s18  ;;  %p41_p12 = scmp.ne.s32.totalorder %s2150_s11, %s2146_s10 }
  0x46   : > { %p32_p7 = scmp.eq.s32.totalorder %s31_s21, 0  ;;  %p42_p1 = scmp.eq.s32.totalorder %s2154_s12, 0 }
  0x47   : > { %p2330_p9 = por %p239_p2, %p41_p12  ;;  %p1819_p13 = scmp.lt.s32.totalorder %s2154_s12, 2 }
  0x48   : > { %s2336_s23 = scalar_select %p32_p7, %s2150_s11, %s34_s20  }
  0x49   : > { %s2526_s19 = scalar_select %p2330_p9, 1, 0 }
  0x4a   : > { %p43_p0 = por %p42_p1, %p41_p12  ;;  %s329_s25 = sand.u32 1, %s2150_s11  }
  0x4b   : > { %s1771_s22 = smul.u32 112, %s329_s25  ;;  %s2351_s21 = scalar_lea.sflag [#allocation3], %s329_s25 }
  0x4c   : > { %s1772_s26 = smul.u32 1792, %s2154_s12  ;;  %p2340_p11 = pnand %p1819_p13, %p43_p0 }
  0x4d   : > { %s333_s14 = scalar_lea.vmem [#allocation2], %s1771_s22 }
  0x4e   : > { %s2347_s24 = scalar_lea.hbm %s2502_s0, %s1772_s26  ;;  %s341_s20 = sshll.u32 %s333_s14, 4  ;;  %s2349_s20 = int_to_ptr.vmem [resolvable:$true] %s341_s20 }
  0x4f   : > { %s2054_s1 = scalar_lea.hbm %s2347_s24, 1792  ;;  %p2056_p3 = pneg %p2340_p11 }
  0x50   : > { %p2055_p2 = scmp.ne.s32.totalorder %s2347_s24, %s2054_s1  ;;  %s2059_s26 = scalar_lea.hbm %s2502_s0, 3584 }
  0x51   : > { %p2060_p12 = scmp.lt.s32.totalorder %s2347_s24, %s2502_s0  ;;  %p2061_p7 = scmp.lt.s32.totalorder %s2059_s26, %s2054_s1 }
  0x52   : > { %p2057_p5 = pnand %p2056_p3, %p2055_p2 }
  0x53   : > { %p2062_p1 = por %p2061_p7, %p2060_p12 }
  0x54   : > { %p2058_p10 = pneg %p2057_p5 }
  0x56   : > { %p2063_p13 = pnand %p2062_p1, %p2058_p10 }
  0x58   : > { %2066 = shalt.err (!%p2063_p13)
}
  0x59   : > { %s2067_s25 = scalar_lea.vmem %s2349_s20, 1792  ;;  %s2162_s22 = smov [#allocation2]  }
  0x5a   : > { %p2068_p0 = scmp.ne.s32.totalorder %s2349_s20, %s2067_s25  ;;  %s2072_s14 = sshll.u32 %s2162_s22, 4  ;;  %s2073_s14 = int_to_ptr.vmem [resolvable:$false] %s2072_s14 }
  0x5b   : > { %s2074_s3 = scalar_lea.vmem %s2073_s14, 3584  ;;  %p2075_p5 = scmp.lt.s32.totalorder %s2349_s20, %s2073_s14 }
  0x5c   : > { %p2070_p6 = pnand %p2068_p0, %p2056_p3  ;;  %p2076_p9 = scmp.lt.s32.totalorder %s2074_s3, %s2067_s25 }
  0x5e   : > { %p2071_p2 = pneg %p2070_p6  ;;  %p2077_p4 = por %p2076_p9, %p2075_p5 }
  0x60   : > { %p2078_p8 = pnand %p2077_p4, %p2071_p2 }
  0x62   : > { %2081 = shalt.err (!%p2078_p8)
}
  0x63   : > { %s2163_s1 = smov 896   ;;  %s2164_s5 = smov 56  }
  0x64   : > { %1810 = dma.hbm_to_vmem [thread:$0]  (!%p2340_p11), %s2347_s24, 1792, %s2349_s20, %s2351_s21, %s2163_s1, %s2163_s1, %s2164_s5  }
  0x65   : > { %p2528_p3 = scmp.ne.s32.totalorder %s2521_s17, 0 }
  0x66   : > { %s2375_s28 = sand.u32 (!%p2528_p3), 1, %s2146_s10   ;;  %p2529_p4 = scmp.ne.s32.totalorder (!%p2528_p3), %s2519_s15, 0 }
  0x67   : > { %353 = sbr.rel (%p2528_p3) target bundleno = 1322 (0x52a), region = 56  ;;  %s356_s29 = scalar_lea.sflag (!%p2528_p3), [#allocation3], %s2375_s28 }
  0x68   : > { %s1773_s26 = smul.u32 (!%p2528_p3), 112, %s2375_s28 }
  0x6a   : > { %s2379_s25 = scalar_lea.vmem (!%p2528_p3), [#allocation2], %s1773_s26 }
  0x6c   : > { %2125 = dma.done.wait (%p2529_p4), %s356_s29, 1792  }
  0x6d   : > { %2127 = vsyncadd (%p2529_p4), %s356_s29, 4294965504  ;;  %p2530_p6 = scmp.eq.s32.totalorder %s2241_s13, 0 }
  0x6f   : > { %2129 = dma.done.wait (%p2530_p6), [#allocation6], 7296   ;;  %p2531_p8 = pmov %p2530_p6 }
  0x70   : > { %p2532_p9 = pmov %p2530_p6 }
  0x71   : > { %2131 = vsyncadd (%p2531_p8), [#allocation6], 4294960000 }
  0x72   : > { %2133 = dma.done.wait (%p2532_p9), [#allocation9], 2048   ;;  %p2533_p11 = pmov %p2530_p6 }
  0x73   : > { %v1869_v0 = vld [vmem:[#allocation5 + $0x78] sm:$0xff]   ;;  %v1873_v4 = vld [vmem:[#allocation5 + $0x70] sm:$0xff]   ;;  %v1877_v8 = vld [vmem:[#allocation5 + $0x68] sm:$0xff]   ;;  %v2165_v43 = vmov 0.0   ;;  %vm2166_vm0 = vmmov 0   ;;  %vm833_vm1 = vcmask 130048  }
  0x74   : > { %2135 = vsyncadd (%p2533_p11), [#allocation9], 4294965248  ;;  %v1870_v1 = vld [vmem:[#allocation5 + $0x38] sm:$0xff]   ;;  %1610 = vmatprep.subr.bf16.mxu0 %v1869_v0  ;;  %v1874_v5 = vld [vmem:[#allocation5 + $0x30] sm:$0xff]   ;;  %s1516_s3 = sshll.u32 %s2375_s28, 3  ;;  %s1604_s1 = sshll.u32 %s2241_s13, 7 }
  0x75   : > { %v1871_v2 = vld [vmem:[#allocation5 + $0xf8] sm:$0xff]   ;;  %1611 = vmatpush3.bf16.msra.mxu0 %v1870_v1  ;;  %v1875_v6 = vld [vmem:[#allocation5 + $0xf0] sm:$0xff]   ;;  %v1878_v9 = vld [vmem:[#allocation5 + $0x28] sm:$0xff]   ;;  %s409_s5 = scalar_lea.vmem [#allocation11], %s1516_s3  ;;  %s2457_s15 = scalar_lea.hbm %s2511_s9, %s1604_s1 }
  0x76   : > { %v1872_v3 = vld [vmem:[#allocation5 + $0xb8] sm:$0xff]   ;;  %1632 = vmatprep.subr.bf16.mxu1 %v1871_v2  ;;  %1612 = vmatprep.subr.bf16.mxu0 %v1873_v4  ;;  %v1876_v7 = vld [vmem:[#allocation5 + $0xb0] sm:$0xff]   ;;  %v1879_v10 = vld [vmem:[#allocation5 + $0xe8] sm:$0xff]   ;;  %s1390_s26 = sshll.u32 %s409_s5, 4  ;;  %s1377_s17 = scalar_lea.sflag [#allocation4], %s2375_s28  ;;  %s2459_s26 = int_to_ptr.vmem [resolvable:$true] %s1390_s26 }
  0x77   : > { %1633 = vmatpush3.bf16.msra.mxu1 %v1872_v3  ;;  %v1880_v11 = vld [vmem:[#allocation5 + $0xa8] sm:$0xff]   ;;  %v1881_v12 = vld [vmem:[#allocation5 + $0x60] sm:$0xff]   ;;  %v1885_v16 = vld [vmem:[#allocation5 + $0x58] sm:$0xff]   ;;  %s2082_s27 = scalar_lea.vmem %s2459_s26, 128  ;;  %p2534_p12 = scmp.ne.s32.totalorder %s2526_s19, 0 }
  0x78   : > { %1634 = vmatprep.subr.bf16.mxu1 %v1875_v6  ;;  %v1882_v13 = vld [vmem:[#allocation5 + $0x20] sm:$0xff]   ;;  %v1886_v17 = vld [vmem:[#allocation5 + $0x18] sm:$0xff]   ;;  %v1889_v20 = vld [vmem:[#allocation5 + $0x50] sm:$0xff]   ;;  %p2083_p10 = scmp.ne.s32.totalorder %s2459_s26, %s2082_s27  ;;  %s2167_s13 = smov [#allocation11]  }
  0x79   : > { %1613 = vmatpush3.bf16.msra.mxu0 %v1874_v5  ;;  %v1883_v14 = vld [vmem:[#allocation5 + $0xe0] sm:$0xff]   ;;  %v1887_v18 = vld [vmem:[#allocation5 + $0xd8] sm:$0xff]   ;;  %v1890_v21 = vld [vmem:[#allocation5 + $0x10] sm:$0xff]   ;;  %s2086_s24 = sshll.u32 %s2167_s13, 4  ;;  %s2087_s24 = int_to_ptr.vmem [resolvable:$false] %s2086_s24 }
  0x7a   : > { %1614 = vmatprep.subr.bf16.mxu0 %v1877_v8  ;;  %v1884_v15 = vld [vmem:[#allocation5 + $0xa0] sm:$0xff]   ;;  %v1888_v19 = vld [vmem:[#allocation5 + $0x98] sm:$0xff]   ;;  %v1891_v22 = vld [vmem:[#allocation5 + $0xd0] sm:$0xff]   ;;  %p2084_p7 = pnand %p2083_p10, %p2534_p12  ;;  %s2088_s20 = scalar_lea.vmem %s2087_s24, 256 }
  0x7b   : > { %1635 = vmatpush3.bf16.msra.mxu1 %v1876_v7  ;;  %v1892_v23 = vld [vmem:[#allocation5 + $0x90] sm:$0xff]   ;;  %v1893_v24 = vld [vmem:[#allocation5 + $0x48] sm:$0xff]   ;;  %v1897_v28 = vld [vmem:[#allocation5 + $0x40] sm:$0xff]   ;;  %p2089_p13 = scmp.lt.s32.totalorder %s2459_s26, %s2087_s24  ;;  %p2090_p0 = scmp.lt.s32.totalorder %s2088_s20, %s2082_s27 }
  0x7c   : > { %1636 = vmatprep.subr.bf16.mxu1 %v1879_v10  ;;  %v1894_v25 = vld [vmem:[#allocation5 + $0x8] sm:$0xff]   ;;  %v1898_v29 = vld [vmem:[#allocation5] sm:$0xff]   ;;  %v1901_v38 = vld [vmem:[#allocation5 + $0x178] sm:$0xff]   ;;  %p2085_p1 = pneg %p2084_p7 }
  0x7d   : > { %1615 = vmatpush3.bf16.msra.mxu0 %v1878_v9  ;;  %v1895_v26 = vld [vmem:[#allocation5 + $0xc8] sm:$0xff]   ;;  %v1899_v30 = vld [vmem:[#allocation5 + $0xc0] sm:$0xff]   ;;  %v1902_v42 = vld [vmem:[#allocation5 + $0x138] sm:$0xff]   ;;  %p2091_p2 = por %p2090_p0, %p2089_p13 }
  0x7e   : > { %1616 = vmatprep.subr.bf16.mxu0 %v1881_v12  ;;  %v1896_v27 = vld [vmem:[#allocation5 + $0x88] sm:$0xff]   ;;  %v421_v32 = vld [vmem:[%s2379_s25 + $0x40] sm:$0xff]  ;;  %v423_v40 = vld [vmem:[%s2379_s25 + $0x50] sm:$0xff] }
  0x7f   : > { %1637 = vmatpush3.bf16.msra.mxu1 %v1880_v11  ;;  %v414_v31 = vld [vmem:[%s2379_s25 + $0x8] sm:$0xff]  ;;  %v1900_v34 = vld [vmem:[#allocation5 + $0x80] sm:$0xff]   ;;  %v420_v36 = vld [vmem:[%s2379_s25 + $0x38] sm:$0xff]  ;;  %p2092_p5 = pnand %p2091_p2, %p2085_p1 }
  0x80   : > { %1638 = vmatprep.subr.bf16.mxu1 %v1883_v14  ;;  %v428_v33 = vpack.c.bf16 %v421_v32, %v414_v31  ;;  %v413_v35 = vld [vmem:[%s2379_s25] sm:$0xff]  ;;  %v416_v39 = vld [vmem:[%s2379_s25 + $0x18] sm:$0xff]  ;;  %v415_v44 = vld [vmem:[%s2379_s25 + $0x10] sm:$0xff] }
  0x81   : > { %1617 = vmatpush3.bf16.msra.mxu0 %v1882_v13  ;;  %v427_v37 = vpack.c.bf16 %v420_v36, %v413_v35  ;;  %v430_v41 = vpack.c.bf16 %v423_v40, %v416_v39  ;;  %v422_v45 = vld [vmem:[%s2379_s25 + $0x48] sm:$0xff]  ;;  %v1903_v47 = vld [vmem:[#allocation5 + $0x170] sm:$0xff]   ;;  %v1907_v51 = vld [vmem:[#allocation5 + $0x160] sm:$0xff]  }
  0x82   : > { %1618 = vmatprep.subr.bf16.mxu0 %v1885_v16  ;;  %869 = vmatprep.mubr.bf16.mxu0 %v428_v33  ;;  %v429_v46 = vpack.c.bf16 %v422_v45, %v415_v44  ;;  %v1904_v48 = vld [vmem:[#allocation5 + $0x130] sm:$0xff]   ;;  %v1905_v49 = vld [vmem:[#allocation5 + $0x168] sm:$0xff]   ;;  %v1908_v52 = vld [vmem:[#allocation5 + $0x120] sm:$0xff]  }
  0x83   : > { %1639 = vmatpush3.bf16.msra.mxu1 %v1884_v15  ;;  %910 = vmatprep.mubr.bf16.mxu1 %v430_v41  ;;  %v1906_v50 = vld [vmem:[#allocation5 + $0x128] sm:$0xff]   ;;  %v1909_v53 = vld [vmem:[#allocation5 + $0x158] sm:$0xff]   ;;  %v1911_v55 = vld [vmem:[#allocation5 + $0x150] sm:$0xff]  }
  0x84   : > { %1640 = vmatprep.subr.bf16.mxu1 %v1887_v18  ;;  %v1910_v54 = vld [vmem:[#allocation5 + $0x118] sm:$0xff]   ;;  %v1917_v56 = vld [vmem:[#allocation5 + $0x180] sm:$0xff]   ;;  %v1912_v58 = vld [vmem:[#allocation5 + $0x110] sm:$0xff]  }
  0x85   : > { %1619 = vmatpush3.bf16.msra.mxu0 %v1886_v17  ;;  %v418_v57 = vld [vmem:[%s2379_s25 + $0x28] sm:$0xff]  ;;  %v425_v60 = vld [vmem:[%s2379_s25 + $0x60] sm:$0xff]  ;;  %v419_v62 = vld [vmem:[%s2379_s25 + $0x30] sm:$0xff] }
  0x86   : > { %1620 = vmatprep.subr.bf16.mxu0 %v1889_v20  ;;  %v1913_v59 = vld [vmem:[#allocation5 + $0x148] sm:$0xff]   ;;  %v432_v61 = vpack.c.bf16 %v425_v60, %v418_v57  ;;  %v1915_v2 = vld [vmem:[#allocation5 + $0x140] sm:$0xff]   ;;  %v1919_v8 = vld [vmem:[#allocation7 + $0x30] sm:$0xff]  }
  0x87   : > { %1641 = vmatpush3.bf16.msra.mxu1 %v1888_v19  ;;  %v426_v63 = vld [vmem:[%s2379_s25 + $0x68] sm:$0xff]  ;;  %v1916_v3 = vld [vmem:[#allocation5 + $0x100] sm:$0xff]   ;;  %v424_v5 = vld [vmem:[%s2379_s25 + $0x58] sm:$0xff] }
  0x88   : > { %1642 = vmatprep.subr.bf16.mxu1 %v1891_v22  ;;  %v433_v0 = vpack.c.bf16 %v426_v63, %v419_v62  ;;  %v1914_v1 = vld [vmem:[#allocation5 + $0x108] sm:$0xff]   ;;  %v417_v4 = vld [vmem:[%s2379_s25 + $0x20] sm:$0xff]  ;;  %v1923_v12 = vld [vmem:[#allocation7 + $0x10] sm:$0xff]  }
  0x89   : > { %1621 = vmatpush3.bf16.msra.mxu0 %v1890_v21  ;;  %v431_v6 = vpack.c.bf16 %v424_v5, %v417_v4  ;;  %v1918_v7 = vld [vmem:[#allocation7 + $0x38] sm:$0xff]   ;;  %v1920_v9 = vld [vmem:[#allocation7 + $0x28] sm:$0xff]   ;;  %v1921_v10 = vld [vmem:[#allocation7 + $0x20] sm:$0xff]  }
  0x8a   : > { %1622 = vmatprep.subr.bf16.mxu0 %v1893_v24  ;;  %v1922_v11 = vld [vmem:[#allocation7 + $0x18] sm:$0xff]   ;;  %v1924_v13 = vld [vmem:[#allocation7 + $0x8] sm:$0xff]   ;;  %v1925_v14 = vld [vmem:[#allocation7] sm:$0xff]  }
  0x8b   : > { %1643 = vmatpush3.bf16.msra.mxu1 %v1892_v23  ;;  %v1926_v15 = vld [vmem:[#allocation8 + $0x38] sm:$0xff]   ;;  %v1927_v16 = vld [vmem:[#allocation8 + $0x30] sm:$0xff]   ;;  %v1928_v17 = vld [vmem:[#allocation8 + $0x28] sm:$0xff]  }
  0x8c   : > { %1644 = vmatprep.subr.bf16.mxu1 %v1895_v26  ;;  %v1929_v18 = vld [vmem:[#allocation8 + $0x20] sm:$0xff]   ;;  %v1930_v19 = vld [vmem:[#allocation8 + $0x18] sm:$0xff]   ;;  %v1936_v60 = vld [vmem:[#allocation10 + $0x28] sm:$0xff]  }
  0x8d   : > { %1623 = vmatpush3.bf16.msra.mxu0 %v1894_v25  ;;  %v1517_v32 = vld [vmem:[%s2504_s2] ss:$0 sm:$0xff]  ;;  %v1933_v57 = vld [vmem:[#allocation8] sm:$0xff]  }
  0x8e   : > { %1624 = vmatprep.subr.bf16.mxu0 %v1897_v28  ;;  %v1938_v62 = vld [vmem:[#allocation10 + $0x18] sm:$0xff]  }
  0x8f   : > { %1645 = vmatpush3.bf16.msra.mxu1 %v1896_v27  ;;  %v1568_v63 = vld [vmem:[%s2506_s4] ss:$0 sm:$0xff] }
  0x90   : > { %1646 = vmatprep.subr.bf16.mxu1 %v1899_v30 }
  0x91   : > { %1625 = vmatpush3.bf16.msra.mxu0 %v1898_v29 }
  0x92   : > { %1654 = vmatprep.subr.bf16.mxu0 %v1901_v38 }
  0x93   : > { %1647 = vmatpush3.bf16.msra.mxu1 %v1900_v34 }
  0x94   : > { %1705 = vmatprep.subr.bf16.mxu1 %v2165_v43  ;;  %870 = vmatmul.mubr.bf16.vlgmr.msra.gmra.mxu0 %v427_v37 }
  0x95   : > { %1655 = vmatpush3.bf16.msra.mxu0 %v1902_v42  ;;  %951 = vmatprep.mubr.bf16.mxu0 %v432_v61  ;;  %v1937_v61 = vld [vmem:[#allocation10 + $0x20] sm:$0xff]  }
  0x96   : > { %911 = vmatmul.mubr.bf16.vlgmr.msra.gmra.mxu1 %v429_v46  ;;  %1656 = vmatprep.subr.bf16.mxu0 %v1903_v47 }
  0x97   : > { %1707 = vmatprep.mubr.msk.bf16.mxu1 %vm2166_vm0, %v2165_v43  ;;  %1706 = vmatpush3.bf16.msra.mxu1 %v1917_v56  ;;  %v1932_v56 = vld [vmem:[#allocation8 + $0x8] sm:$0xff]  }
  0x98   : > { %1711 = vmatprep.subr.bf16.mxu1 %v2165_v43 }
  0x99   : > { %1657 = vmatpush3.bf16.msra.mxu0 %v1904_v48 }
  0x9a   : > { %1658 = vmatprep.subr.bf16.mxu0 %v1905_v49 }
  0x9d   : > { %1659 = vmatpush3.bf16.msra.mxu0 %v1906_v50 }
  0x9e   : > { %1660 = vmatprep.subr.bf16.mxu0 %v1907_v51  ;;  %1708 = vmatmul.mubr.msk.bf16.vlgmr.msra.gmra.mxu1 %vm833_vm1, %v433_v0 }
  0x9f   : > { %1727 = vmatprep.mubr.msk.bf16.mxu1 %vm2166_vm0, %v2165_v43  ;;  %1712 = vmatpush3.bf16.msra.mxu1 %v1918_v7 }
  0xa0   : > { %1713 = vmatprep.subr.bf16.mxu1 %v2165_v43 }
  0xa1   : > { %1661 = vmatpush3.bf16.msra.mxu0 %v1908_v52 }
  0xa2   : > { %1662 = vmatprep.subr.bf16.mxu0 %v1909_v53 }
  0xa3   : > { %1714 = vmatpush3.bf16.msra.mxu1 %v1919_v8 }
  0xa4   : > { %1715 = vmatprep.subr.bf16.mxu1 %v2165_v43 }
  0xa5   : > { %1663 = vmatpush3.bf16.msra.mxu0 %v1910_v54 }
  0xa6   : > { %1664 = vmatprep.subr.bf16.mxu0 %v1911_v55  ;;  %v1931_v55 = vld [vmem:[#allocation8 + $0x10] sm:$0xff]  }
  0xa7   : > { %1716 = vmatpush3.bf16.msra.mxu1 %v1920_v9  ;;  %v1939_v9 = vld [vmem:[#allocation10 + $0x10] sm:$0xff]  }
  0xa8   : > { %1717 = vmatprep.subr.bf16.mxu1 %v2165_v43 }
  0xa9   : > { %1665 = vmatpush3.bf16.msra.mxu0 %v1912_v58  ;;  %v1934_v58 = vld [vmem:[#allocation10 + $0x38] sm:$0xff]  }
  0xaa   : > { %1666 = vmatprep.subr.bf16.mxu0 %v1913_v59  ;;  %v1935_v59 = vld [vmem:[#allocation10 + $0x30] sm:$0xff]  }
  0xab   : > { %1718 = vmatpush3.bf16.msra.mxu1 %v1921_v10  ;;  %v1940_v10 = vld [vmem:[#allocation10 + $0x8] sm:$0xff]  }
  0xac   : > { %1719 = vmatprep.subr.bf16.mxu1 %v2165_v43 }
  0xad   : > { %1667 = vmatpush3.bf16.msra.mxu0 %v1914_v1 }
  0xae   : > { %1668 = vmatprep.subr.bf16.mxu0 %v1915_v2 }
  0xaf   : > { %1720 = vmatpush3.bf16.msra.mxu1 %v1922_v11  ;;  %v1941_v11 = vld [vmem:[#allocation10] sm:$0xff]  }
  0xb0   : > { %1721 = vmatprep.subr.bf16.mxu1 %v2165_v43 }
  0xb1   : > { %1669 = vmatpush3.bf16.msra.mxu0 %v1916_v3 }
  0xb2   : > { %1731 = vmatprep.subr.bf16.mxu0 %v2165_v43 }
  0xb3   : > { %1722 = vmatpush3.bf16.msra.mxu1 %v1923_v12  ;;  %v1577_v12 = vld [vmem:[%s2508_s6] ss:$0 sm:$0xff] }
  0xb4   : > { %952 = vmatmul.mubr.bf16.vlgmr.msra.gmra.mxu0 %v431_v6  ;;  %1723 = vmatprep.subr.bf16.mxu1 %v2165_v43 }
  0xb5   : > { %1747 = vmatprep.mubr.msk.bf16.mxu0 %vm2166_vm0, %v2165_v43  ;;  %1732 = vmatpush3.bf16.msra.mxu0 %v1926_v15 }
  0xb6   : > { %1733 = vmatprep.subr.bf16.mxu0 %v2165_v43 }
  0xb7   : > { %1724 = vmatpush3.bf16.msra.mxu1 %v1924_v13 }
  0xb8   : > { %1725 = vmatprep.subr.bf16.mxu1 %v2165_v43 }
  0xb9   : > { %1734 = vmatpush3.bf16.msra.mxu0 %v1927_v16 }
  0xba   : > { %1735 = vmatprep.subr.bf16.mxu0 %v2165_v43 }
  0xbb   : > { %1726 = vmatpush3.bf16.msra.mxu1 %v1925_v14 }
  0xbc   : > { %1751 = vmatprep.subr.bf16.mxu1 %v2165_v43 }
  0xbd   : > { %1736 = vmatpush3.bf16.msra.mxu0 %v1928_v17 }
  0xbe   : > { %1737 = vmatprep.subr.bf16.mxu0 %v2165_v43 }
  0xc1   : > { %1738 = vmatpush3.bf16.msra.mxu0 %v1929_v18 }
  0xc2   : > { %1739 = vmatprep.subr.bf16.mxu0 %v2165_v43 }
  0xc5   : > { %1740 = vmatpush3.bf16.msra.mxu0 %v1930_v19 }
  0xc6   : > { %1741 = vmatprep.subr.bf16.mxu0 %v2165_v43 }
  0xc9   : > { %1742 = vmatpush3.bf16.msra.mxu0 %v1931_v55 }
  0xca   : > { %1743 = vmatprep.subr.bf16.mxu0 %v2165_v43 }
  0xcd   : > { %1744 = vmatpush3.bf16.msra.mxu0 %v1932_v56 }
  0xce   : > { %1745 = vmatprep.subr.bf16.mxu0 %v2165_v43 }
  0xd1   : > { %1746 = vmatpush3.bf16.msra.mxu0 %v1933_v57 }
 0x154   : > { %v1626_v23 = vpop.f32.mrf.mxu0 }
 0x156   : > { %v1648_v20 = vpop.f32.mrf.mxu1  ;;  %v1627_v25 = vpop.f32.mrf.mxu0 }
 0x157   : > { %v1628_v31 = vadd.f32 %v1627_v25, %v1626_v23 }
 0x158   : > { %v1649_v21 = vpop.f32.mrf.mxu1  ;;  %v1629_v28 = vpop.f32.mrf.mxu0 }
 0x159   : > { %v872_v34 = vadd.f32 %v1628_v31, %v1517_v32  ;;  %v1650_v35 = vadd.f32 %v1649_v21, %v1648_v20 }
 0x15a   : > { %v1651_v22 = vpop.f32.mrf.mxu1  ;;  %v1630_v33 = vpop.f32.mrf.mxu0 }
 0x15b   : > { %v1631_v36 = vadd.f32 %v1630_v33, %v1629_v28  ;;  %v913_v39 = vadd.f32 %v1650_v35, %v872_v34 }
 0x15c   : > { %v1652_v24 = vpop.f32.mrf.mxu1 }
 0x15d   : > { %v875_v40 = vadd.f32 %v1631_v36, %v1517_v32  ;;  %v1653_v41 = vadd.f32 %v1652_v24, %v1651_v22 }
 0x15e   : > { %v994_v26 = vpop.f32.mrf.mxu1 }
 0x15f   : > { %v916_v47 = vadd.f32 %v1653_v41, %v875_v40 }
 0x160   : > { %v1709_v27 = vpop.f32.mrf.mxu1 }
 0x162   : > { %v997_v29 = vpop.f32.mrf.mxu1 }
 0x164   : > { %v1710_v30 = vpop.f32.mrf.mxu1 }
 0x174   : > { %v1670_v37 = vpop.f32.mrf.mxu0 }
 0x176   : > { %v1671_v38 = vpop.f32.mrf.mxu0 }
 0x177   : > { %v1672_v42 = vadd.f32 %v1671_v38, %v1670_v37 }
 0x178   : > { %v1673_v44 = vpop.f32.mrf.mxu0 }
 0x179   : > { %v954_v45 = vadd.f32 %v1672_v42, %v913_v39 }
 0x17a   : > { %v1674_v46 = vpop.f32.mrf.mxu0 }
 0x17b   : > { %v1675_v48 = vadd.f32 %v1674_v46, %v1673_v44  ;;  %v995_v49 = vadd.f32 %v994_v26, %v954_v45 }
 0x17d   : > { %v957_v50 = vadd.f32 %v1675_v48, %v916_v47  ;;  %v1001_v52 = vmax.f32 %v995_v49, 0.0 }
 0x17f   : > { %v998_v51 = vadd.f32 %v997_v29, %v957_v50 }
 0x181   : > { %v1002_v53 = vmax.f32 %v998_v51, 0.0 }
 0x183   : > { %v1003_v54 = vpack.c.bf16 %v1002_v53, %v1001_v52 }
 0x185   : > { %1728 = vmatmul.mubr.bf16.vlgmr.msra.gmra.mxu1 %v1003_v54 }
 0x186   : > { %1767 = vmatprep.mubr.msk.bf16.mxu1 %vm2166_vm0, %v2165_v43  ;;  %1752 = vmatpush3.bf16.msra.mxu1 %v1934_v58 }
 0x187   : > { %1753 = vmatprep.subr.bf16.mxu1 %v2165_v43 }
 0x18a   : > { %1754 = vmatpush3.bf16.msra.mxu1 %v1935_v59 }
 0x18b   : > { %1755 = vmatprep.subr.bf16.mxu1 %v2165_v43 }
 0x18e   : > { %1756 = vmatpush3.bf16.msra.mxu1 %v1936_v60 }
 0x18f   : > { %1757 = vmatprep.subr.bf16.mxu1 %v2165_v43 }
 0x192   : > { %1758 = vmatpush3.bf16.msra.mxu1 %v1937_v61 }
 0x193   : > { %1759 = vmatprep.subr.bf16.mxu1 %v2165_v43 }
 0x196   : > { %1760 = vmatpush3.bf16.msra.mxu1 %v1938_v62 }
 0x197   : > { %1761 = vmatprep.subr.bf16.mxu1 %v2165_v43 }
 0x19a   : > { %1762 = vmatpush3.bf16.msra.mxu1 %v1939_v9 }
 0x19b   : > { %1763 = vmatprep.subr.bf16.mxu1 %v2165_v43 }
 0x19e   : > { %1764 = vmatpush3.bf16.msra.mxu1 %v1940_v10 }
 0x19f   : > { %1765 = vmatprep.subr.bf16.mxu1 %v2165_v43  ;;  %v1586_v43 = vld [vmem:[%s2510_s8] ss:$0 sm:$0xff] }
 0x1a2   : > { %1766 = vmatpush3.bf16.msra.mxu1 %v1941_v11 }
 0x245   : > { %v1109_v0 = vpop.f32.mrf.mxu1 }
 0x246   : > { %v1110_v2 = vadd.f32 %v1568_v63, %v1109_v0 }
 0x247   : > { %v1729_v1 = vpop.f32.mrf.mxu1 }
 0x248   : > { %v1116_v6 = vmax.f32 %v1110_v2, 0.0 }
 0x249   : > { %v1112_v3 = vpop.f32.mrf.mxu1 }
 0x24a   : > { %v1113_v4 = vadd.f32 %v1568_v63, %v1112_v3 }
 0x24b   : > { %v1730_v5 = vpop.f32.mrf.mxu1 }
 0x24c   : > { %v1117_v7 = vmax.f32 %v1113_v4, 0.0 }
 0x24e   : > { %v1118_v8 = vpack.c.bf16 %v1117_v7, %v1116_v6 }
 0x250   : > { %1748 = vmatmul.mubr.bf16.vlgmr.msra.gmra.mxu0 %v1118_v8 }
 0x310   : > { %v1224_v13 = vpop.f32.mrf.mxu0 }
 0x311   : > { %v1225_v15 = vadd.f32 %v1577_v12, %v1224_v13 }
 0x312   : > { %v1749_v14 = vpop.f32.mrf.mxu0 }
 0x313   : > { %v1231_v19 = vmax.f32 %v1225_v15, 0.0 }
 0x314   : > { %v1227_v16 = vpop.f32.mrf.mxu0 }
 0x315   : > { %v1228_v17 = vadd.f32 %v1577_v12, %v1227_v16 }
 0x316   : > { %v1750_v18 = vpop.f32.mrf.mxu0 }
 0x317   : > { %v1232_v20 = vmax.f32 %v1228_v17, 0.0 }
 0x319   : > { %v1233_v21 = vpack.c.bf16 %v1232_v20, %v1231_v19 }
 0x31b   : > { %1768 = vmatmul.mubr.bf16.vlgmr.msra.gmra.mxu1 %v1233_v21 }
 0x3db   : > { %v1339_v22 = vpop.f32.mrf.mxu1 }
 0x3dc   : > { %v1340_v23 = vadd.f32 %v1586_v43, %v1339_v22 }
 0x3dd   : > { %v1769_v24 = vpop.f32.mrf.mxu1 }
 0x3de   : > { %1346 = vmax.xlane.f32.xlu0 %v1340_v23 }
 0x3df   : > { %v1342_v25 = vpop.f32.mrf.mxu1 }
 0x3e0   : > { %v1343_v26 = vadd.f32 %v1586_v43, %v1342_v25 }
 0x3e1   : > { %v1770_v27 = vpop.f32.mrf.mxu1 }
 0x3e2   : > { %1348 = vmax.xlane.f32.xlu0 %v1343_v26 }
 0x467   : > { %v1347_v28 = vpop.xlane.xlu0 %1346 }
 0x468   : > { %v1350_v29 = vsub.f32 %v1340_v23, %v1347_v28 }
 0x46a   : > { %v1352_v30 = vmul.f32 1.442695, %v1350_v29 }
 0x46b   : > { %v1349_v31 = vpop.xlane.xlu0 %1348 }
 0x46c   : > { %v1351_v32 = vsub.f32 %v1343_v26, %v1349_v31  ;;  %1942 = vpow2.f32 %v1352_v30 }
 0x46e   : > { %v1354_v33 = vmul.f32 1.442695, %v1351_v32 }
 0x470   : > { %1944 = vpow2.f32 %v1354_v33 }
 0x479   : > { %v1943_v34 = vpop.eup %1942 }
 0x47a   : > { %1356 = vadd.xlane.f32.xlu1 %v1943_v34 }
 0x47d   : > { %v1945_v35 = vpop.eup %1944 }
 0x47e   : > { %1358 = vadd.xlane.f32.xlu1 %v1945_v35 }
 0x503   : > { %v1357_v36 = vpop.xlane.xlu1 %1356 }
 0x504   : > { %1946 = vlog2.f32 %v1357_v36 }
 0x507   : > { %v1359_v37 = vpop.xlane.xlu1 %1358 }
 0x508   : > { %1948 = vlog2.f32 %v1359_v37 }
 0x511   : > { %v1947_v38 = vpop.eup %1946 }
 0x512   : > { %v1361_v39 = vmul.f32 0.6931472, %v1947_v38 }
 0x514   : > { %v1364_v42 = vsub.f32 %v1350_v29, %v1361_v39 }
 0x515   : > { %v1949_v40 = vpop.eup %1948 }
 0x516   : > { %v1363_v41 = vmul.f32 0.6931472, %v1949_v40 }
 0x518   : > { %v1365_v44 = vsub.f32 %v1351_v32, %v1363_v41 }
 0x51a   : > { %v1608_v45 = vpack.c.bf16 %v1365_v44, %v1364_v42 }
 0x51c   : > { %1609 = vst [vmem:[%s409_s5] sm:$0xff] %v1608_v45  }
 0x51d   : > { %2095 = shalt.err (!%p2092_p5)
}
 0x51e   : > { %s2096_s21 = scalar_lea.hbm %s2457_s15, 128  ;;  %s2100_s3 = scalar_lea.hbm %s2511_s9, 256 }
 0x51f   : > { %p2097_p3 = scmp.ne.s32.totalorder %s2457_s15, %s2096_s21  ;;  %p2101_p8 = scmp.lt.s32.totalorder %s2457_s15, %s2511_s9 }
 0x520   : > { %p2102_p9 = scmp.lt.s32.totalorder %s2100_s3, %s2096_s21 }
 0x521   : > { %p2098_p4 = pnand %p2097_p3, %p2534_p12 }
 0x522   : > { %p2103_p11 = por %p2102_p9, %p2101_p8 }
 0x523   : > { %p2099_p6 = pneg %p2098_p4 }
 0x525   : > { %p2104_p10 = pnand %p2103_p11, %p2099_p6 }
 0x527   : > { %2107 = shalt.err (!%p2104_p10)
}
 0x528   : > { %s2168_s29 = smov 64   ;;  %s2169_s25 = smov 4  }
 0x529   : > { %1792 = dma.vmem_to_hbm [thread:$0]  (%p2534_p12), %s2459_s26, 128, %s2457_s15, %s1377_s17, %s2168_s29, %s2168_s29, %s2169_s25  }
 0x52a PF: > { %s1405_s27 = sand.u32 1, %s2142_s30   ;;  %p2535_p7 = scmp.ne.s32.totalorder %s2520_s16, 0 }
 0x52b   : > { %p2536_p1 = scmp.ge.s32.totalorder %s2154_s12, 2  ;;  %s1406_s13 = scalar_lea.sflag [#allocation4], %s1405_s27 }
 0x52d   : > { %p1812_p13 = pnand %p2536_p1, %p2535_p7 }
 0x52f   : > { %p1813_p0 = pneg %p1812_p13 }
 0x531   : > { %2137 = dma.done.wait (%p1813_p0), %s1406_s13, 128  }
 0x532   : > { %2139 = vsyncadd (%p1813_p0), %s1406_s13, 4294967168  ;;  %p24_p2 = scmp.ge.s32.totalorder %s2320_s18, 4   ;;  %s2537_s30 = smov %s2146_s10 }
 0x533   : > { %s2538_s10 = smov %s2150_s11  ;;  %s2539_s11 = smov %s2336_s23 }
 0x534   : > { %s2540_s12 = smov %s2320_s18  ;;  %26 = sbr.rel (!%p24_p2) target bundleno = 11 (0xb), region = 117 }
 0x539   :  { %1411 = vsyncpa [#allocation3], 1 }
 0x53a   :  { %1413 = vsyncpa [#allocation3 + $0x1], 1 }
 0x53b   :  { %1414 = vsyncpa [#allocation6], 1 }
 0x53c   :  { %1415 = vsyncpa [#allocation9], 1 }
 0x53d   :  { %1416 = vsyncpa [#allocation4], 1 }
 0x53e   :  { %1418 = vsyncpa [#allocation4 + $0x1], 1 }

</bundles_post_ra>
